<compile_context>
chip_gen: v7x
topology: tpu7x:2x2x1
jax: 0.10.0
libtpu: 0.0.40
codegen_flags: <defaults>
</compile_context>

<pallas_src>
import functools

import jax
import jax.numpy as jnp
import numpy as np
from jax.experimental import pallas as pl
from jax.experimental.pallas import tpu as pltpu

LANE = 128


def _round_up(x, m):
    return (x + m - 1) // m * m


# ------------------------------------------------------------------
# Kernel 1: measure=True, single_timestep=False path
#   grid = (n_chunks,), state carried in resident output blocks.
# ------------------------------------------------------------------
def _decoder_measure_kernel(
    t_base_ref,      # SMEM scalar prefetch (1,) int32
    x_ref,           # VMEM (1, chunk_width, input_dim)   per-chunk block
    ssum_in_ref,     # VMEM (1, input_dim)                constant block
    sbuf_in_ref,     # VMEM (bin_width, input_dim)        constant block
    w1_ref,          # VMEM (input_dim, h_dim)            constant block
    b1_ref,          # VMEM (1, h_dim)                    constant block
    w2_ref,          # VMEM (h_dim, o_pad)                constant block
    b2_ref,          # VMEM (1, o_pad)                    constant block
    tri_ref,         # VMEM (chunk_width, chunk_width)    constant block
    out_ref,         # VMEM (1, 8, o_pad)                 per-chunk block
    sbuf_out_ref,    # VMEM (bin_width, input_dim)        resident accumulator
    ssum_out_ref,    # VMEM (1, input_dim)                resident accumulator
    old_ref,         # VMEM scratch (chunk_width, input_dim)
    *,
    bin_width: int,
    chunk_width: int,
):
    c = pl.program_id(0)

    # State lives in the resident output blocks; seed it from the inputs once.
    @pl.when(c == 0)
    def _():
        sbuf_out_ref[...] = sbuf_in_ref[...]
        ssum_out_ref[...] = ssum_in_ref[...]

    # Non-negative base offset into the circular buffer (handles t_offset < 0).
    t_base = t_base_ref[0]
    t_base = jax.lax.rem(jax.lax.rem(t_base, bin_width) + bin_width, bin_width)
    t0 = t_base + c * chunk_width

    x = x_ref[0]                                           # (chunk, D)

    # Gather the rows this chunk replaces and overwrite them in place.
    # Rows within one chunk are distinct because chunk_width <= bin_width.
    for i in range(chunk_width):
        idx = jax.lax.rem(t0 + i, bin_width)
        old_ref[i:i + 1, :] = sbuf_out_ref[pl.ds(idx, 1), :]
        sbuf_out_ref[pl.ds(idx, 1), :] = x[i:i + 1, :]

    delta = x - old_ref[...]                               # (chunk, D)

    # h_i = relu((ssum + sum_{j<=i} delta_j) @ W1 + b1)
    #     = relu(base + (tri @ (delta @ W1))_i)            (fold via linearity)
    ssum = ssum_out_ref[...]                               # (1, D)
    base = jnp.dot(ssum, w1_ref[...], preferred_element_type=jnp.float32) + b1_ref[...]
    d1 = jnp.dot(delta, w1_ref[...], preferred_element_type=jnp.float32)    # (chunk, H)
    prefix = jnp.dot(tri_ref[...], d1, preferred_element_type=jnp.float32)  # (chunk, H)
    h = jnp.maximum(base + prefix, 0.0)                    # (chunk, H)

    # mean_i(h_i @ W2 + b2) == (mean_i h_i) @ W2 + b2      (fold via linearity)
    h_mean = jnp.sum(h, axis=0, keepdims=True) * (1.0 / float(chunk_width))
    o = jnp.dot(h_mean, w2_ref[...], preferred_element_type=jnp.float32) + b2_ref[...]

    out_ref[...] = jnp.broadcast_to(o.reshape(1, 1, -1), out_ref.shape)
    ssum_out_ref[...] = ssum + jnp.sum(delta, axis=0, keepdims=True)


@functools.partial(jax.jit, static_argnames=("bin_width", "o_dim"))
def decoder_measure_forward(t_offset, inputs_chunks, spike_buf, spike_sum, prepped,
                            *, bin_width, o_dim):
    """measure=True, single_timestep=False branch.

    inputs_chunks: (n_chunks, chunk_width, input_dim).  The torch forward is
    n_chunks == 1; larger n_chunks batches several chunks into one launch
    (weights stay resident in VMEM, state chained through the grid).
    Returns (per-chunk mean outputs (n_chunks, o_dim), new spike_buf, new spike_sum).
    """
    n_chunks, chunk_width, input_dim = inputs_chunks.shape
    w1, b1 = prepped["w1"], prepped["b1"]
    w2p, b2p = prepped["w2p"], prepped["b2p"]
    h_dim = w1.shape[1]
    o_pad = w2p.shape[1]

    # Batched prefix-sum path is exact only when a chunk's circular-buffer rows
    # are distinct.
    assert chunk_width <= bin_width
    # TODO(synk): sequential in-kernel fallback for chunk_width > bin_width.

    tri = jnp.asarray(np.tril(np.ones((chunk_width, chunk_width), np.float32)))
    t_base = jnp.asarray(t_offset, jnp.int32).reshape(1)
    ssum2d = spike_sum.reshape(1, input_dim)

    kernel = functools.partial(_decoder_measure_kernel,
                               bin_width=bin_width, chunk_width=chunk_width)

    grid_spec = pltpu.PrefetchScalarGridSpec(
        num_scalar_prefetch=1,
        grid=(n_chunks,),
        in_specs=[
            pl.BlockSpec((1, chunk_width, input_dim), lambda c, t: (c, 0, 0)),
            pl.BlockSpec((1, input_dim), lambda c, t: (0, 0)),
            pl.BlockSpec((bin_width, input_dim), lambda c, t: (0, 0)),
            pl.BlockSpec((input_dim, h_dim), lambda c, t: (0, 0)),
            pl.BlockSpec((1, h_dim), lambda c, t: (0, 0)),
            pl.BlockSpec((h_dim, o_pad), lambda c, t: (0, 0)),
            pl.BlockSpec((1, o_pad), lambda c, t: (0, 0)),
            pl.BlockSpec((chunk_width, chunk_width), lambda c, t: (0, 0)),
        ],
        out_specs=(
            pl.BlockSpec((1, 8, o_pad), lambda c, t: (c, 0, 0)),
            pl.BlockSpec((bin_width, input_dim), lambda c, t: (0, 0)),
            pl.BlockSpec((1, input_dim), lambda c, t: (0, 0)),
        ),
        scratch_shapes=[pltpu.VMEM((chunk_width, input_dim), jnp.float32)],
    )

    out, new_buf, new_sum = pl.pallas_call(
        kernel,
        grid_spec=grid_spec,
        out_shape=(
            jax.ShapeDtypeStruct((n_chunks, 8, o_pad), jnp.float32),
            jax.ShapeDtypeStruct((bin_width, input_dim), jnp.float32),
            jax.ShapeDtypeStruct((1, input_dim), jnp.float32),
        ),
        compiler_params=pltpu.CompilerParams(dimension_semantics=("arbitrary",)),
    )(t_base, inputs_chunks, ssum2d, spike_buf, w1, b1, w2p, b2p, tri)

    return out[:, 0, :o_dim], new_buf, new_sum[0]


# ------------------------------------------------------------------
# Kernel 2: measure=False path (plain MLP on inputs[0, 0])
# ------------------------------------------------------------------
def _mlp_kernel(x_ref, w1_ref, b1_ref, w2_ref, b2_ref, out_ref):
    h = jnp.dot(x_ref[...], w1_ref[...], preferred_element_type=jnp.float32) + b1_ref[...]
    h = jnp.maximum(h, 0.0)
    o = jnp.dot(h, w2_ref[...], preferred_element_type=jnp.float32) + b2_ref[...]
    out_ref[...] = jnp.broadcast_to(o, out_ref.shape)


@functools.partial(jax.jit, static_argnames=("o_dim",))
def decoder_plain_forward(inputs, prepped, *, o_dim):
    """measure=False branch: FC2(relu(FC1(inputs[0, 0])))."""
    w1, b1 = prepped["w1"], prepped["b1"]
    w2p, b2p = prepped["w2p"], prepped["b2p"]
    input_dim = w1.shape[0]
    o_pad = w2p.shape[1]
    x = inputs[0, 0].reshape(1, input_dim)

    vmem = pl.BlockSpec(memory_space=pltpu.MemorySpace.VMEM)
    out = pl.pallas_call(
        _mlp_kernel,
        out_shape=jax.ShapeDtypeStruct((8, o_pad), jnp.float32),
        in_specs=[vmem] * 5,
        out_specs=vmem,
    )(x, w1, b1, w2p, b2p)
    return out[0, :o_dim]


# ------------------------------------------------------------------
# Param prep (one-time) + DecoderDNN wrapper (mirrors torch module semantics)
# ------------------------------------------------------------------
def prepare_decoder_params(params):
    """One-time: reshape b1 and pad FC2 to a lane-dense width (zeros are inert)."""
    w1, b1, w2, b2 = params
    h_dim = w1.shape[1]
    o_dim = w2.shape[1]
    o_pad = max(LANE, _round_up(o_dim, LANE))
    w2p = jnp.zeros((h_dim, o_pad), jnp.float32).at[:, :o_dim].set(w2)
    b2p = jnp.zeros((1, o_pad), jnp.float32).at[:, :o_dim].set(b2)
    prepped = {
        "w1": jnp.asarray(w1, jnp.float32),
        "b1": jnp.asarray(b1, jnp.float32).reshape(1, h_dim),
        "w2p": w2p,
        "b2p": b2p,
    }
    return prepped, o_dim


def decoder_dnn_forward(prepped, o_dim, bin_width, t_offset, inputs, spike_buf,
                        spike_sum, measure=False, single_timestep=True):
    """Mirror of DecoderDNN.forward (profiling/timing bookkeeping is host-side only)."""
    if measure:
        assert not single_timestep, "single_timestep=True with measure=True asserts in torch"
        out, buf, ssum = decoder_measure_forward(
            jnp.asarray(t_offset, jnp.int32), inputs, spike_buf, spike_sum,
            prepped, bin_width=bin_width, o_dim=o_dim)
        return out[0], buf, ssum
    out = decoder_plain_forward(inputs, prepped, o_dim=o_dim)
    return out, spike_buf, spike_sum


def init_decoder_params(key, input_dim, h_dim, o_dim):
    """Deterministic torch-Linear-style init (uniform +-1/sqrt(fan_in))."""
    k1, k2, k3, k4 = jax.random.split(key, 4)
    s1 = 1.0 / np.sqrt(input_dim)
    s2 = 1.0 / np.sqrt(h_dim)
    w1 = jax.random.uniform(k1, (input_dim, h_dim), jnp.float32, -s1, s1)
    b1 = jax.random.uniform(k2, (h_dim,), jnp.float32, -s1, s1)
    w2 = jax.random.uniform(k3, (h_dim, o_dim), jnp.float32, -s2, s2)
    b2 = jax.random.uniform(k4, (o_dim,), jnp.float32, -s2, s2)
    return (w1, b1, w2, b2)


# ------------------------------------------------------------------
# Pure-numpy reference of the measure path (matches torch serial semantics)
# ------------------------------------------------------------------
def _reference_measure_chunks(t_offset, inputs_chunks, spike_buf, spike_sum, params,
                              bin_width):
    w1, b1, w2, b2 = [np.asarray(p, np.float32) for p in params]
    inputs_chunks = np.asarray(inputs_chunks, np.float32)
    buf = np.array(spike_buf, dtype=np.float32, copy=True)
    ssum = np.array(spike_sum, dtype=np.float32, copy=True)
    n_chunks, chunk_width, _ = inputs_chunks.shape
    means = []
    for c in range(n_chunks):
        outs = []
        for i in range(chunk_width):
            idx = (int(t_offset) + c * chunk_width + i) % bin_width
            ssum = ssum - buf[idx]
            buf[idx] = inputs_chunks[c, i]
            ssum = ssum + inputs_chunks[c, i]
            h = np.maximum(ssum @ w1 + b1, 0.0)
            outs.append(h @ w2 + b2)
        means.append(np.mean(np.stack(outs, 0), axis=0))
    return np.stack(means, 0), buf, ssum


if __name__ == "__main__":
    # small shapes consistent with DecoderDNN(model_name='FC')
    input_dim, h_dim, o_dim = 128, 32, 2
    chunk_width = 8
    bin_width = 120          # module hard-codes 120

    key = jax.random.PRNGKey(0)
    kp, kx1, kx2, kx3, kb = jax.random.split(key, 5)
    params = init_decoder_params(kp, input_dim, h_dim, o_dim)
    prepped, o_dim = prepare_decoder_params(params)

    inputs1 = jax.random.uniform(kx1, (1, chunk_width, input_dim), jnp.float32)
    inputs2 = jax.random.uniform(kx2, (1, chunk_width, input_dim), jnp.float32)
    inputs3 = jax.random.uniform(kx3, (4, chunk_width, input_dim), jnp.float32)
    spike_buf0 = jax.random.uniform(kb, (bin_width, input_dim), jnp.float32)
    spike_sum0 = jnp.sum(spike_buf0, axis=0)          # consistent running sum

    buf0_np = np.array(spike_buf0)
    sum0_np = np.array(spike_sum0)

    # --- measure=True path, call 1 (no wrap-around) ---
    t0a = 5
    out1, buf1, sum1 = decoder_dnn_forward(prepped, o_dim, bin_width, t0a, inputs1,
                                           spike_buf0, spike_sum0,
                                           measure=True, single_timestep=False)
    out1, buf1, sum1 = jax.block_until_ready((out1, buf1, sum1))
    ref_out1, ref_buf1, ref_sum1 = _reference_measure_chunks(
        t0a, np.array(inputs1), buf0_np, sum0_np, params, bin_width)
    np.testing.assert_allclose(np.asarray(out1), ref_out1[0], rtol=2e-3, atol=2e-3)
    np.testing.assert_allclose(np.asarray(buf1), ref_buf1, rtol=1e-6, atol=1e-6)
    np.testing.assert_allclose(np.asarray(sum1), ref_sum1, rtol=2e-3, atol=2e-3)

    # --- measure=True path, call 2 (chained state, wraps the circular buffer) ---
    t0b = 117
    out2, buf2, sum2 = decoder_dnn_forward(prepped, o_dim, bin_width, t0b, inputs2,
                                           buf1, sum1,
                                           measure=True, single_timestep=False)
    out2, buf2, sum2 = jax.block_until_ready((out2, buf2, sum2))
    ref_out2, ref_buf2, ref_sum2 = _reference_measure_chunks(
        t0b, np.array(inputs2), ref_buf1, ref_sum1, params, bin_width)
    np.testing.assert_allclose(np.asarray(out2), ref_out2[0], rtol=2e-3, atol=2e-3)
    np.testing.assert_allclose(np.asarray(buf2), ref_buf2, rtol=1e-6, atol=1e-6)
    np.testing.assert_allclose(np.asarray(sum2), ref_sum2, rtol=2e-3, atol=2e-3)

    # --- measure=True path, 4 chunks batched in a single launch (wraps mid-stream) ---
    t0c = 110
    out3, buf3, sum3 = decoder_measure_forward(jnp.asarray(t0c, jnp.int32), inputs3,
                                               buf2, sum2, prepped,
                                               bin_width=bin_width, o_dim=o_dim)
    out3, buf3, sum3 = jax.block_until_ready((out3, buf3, sum3))
    ref_out3, ref_buf3, ref_sum3 = _reference_measure_chunks(
        t0c, np.array(inputs3), ref_buf2, ref_sum2, params, bin_width)
    np.testing.assert_allclose(np.asarray(out3), ref_out3, rtol=2e-3, atol=2e-3)
    np.testing.assert_allclose(np.asarray(buf3), ref_buf3, rtol=1e-6, atol=1e-6)
    np.testing.assert_allclose(np.asarray(sum3), ref_sum3, rtol=2e-3, atol=2e-3)

    # --- measure=False path ---
    out4, _, _ = decoder_dnn_forward(prepped, o_dim, bin_width, t0a, inputs1,
                                     spike_buf0, spike_sum0,
                                     measure=False, single_timestep=True)
    out4 = jax.block_until_ready(out4)
    w1, b1, w2, b2 = params
    ref4 = np.maximum(np.array(inputs1[0, 0]) @ np.array(w1) + np.array(b1), 0.0) \
           @ np.array(w2) + np.array(b2)
    np.testing.assert_allclose(np.asarray(out4), ref4, rtol=2e-3, atol=2e-3)

    print("KERNEL_OK")
</pallas_src>

<mosaic_0001>
module attributes {stable_mosaic.version = 11 : i64} {
  func.func @_decoder_measure_kernel(%arg0: i32, %arg1: memref<1xi32, #tpu.memory_space<smem>>, %arg2: memref<1x8x128xf32, #tpu.memory_space<vmem>>, %arg3: memref<1x128xf32, #tpu.memory_space<vmem>>, %arg4: memref<120x128xf32, #tpu.memory_space<vmem>>, %arg5: memref<128x32xf32, #tpu.memory_space<vmem>>, %arg6: memref<1x32xf32, #tpu.memory_space<vmem>>, %arg7: memref<32x128xf32, #tpu.memory_space<vmem>>, %arg8: memref<1x128xf32, #tpu.memory_space<vmem>>, %arg9: memref<8x8xf32, #tpu.memory_space<vmem>>, %arg10: memref<1x8x128xf32, #tpu.memory_space<vmem>>, %arg11: memref<120x128xf32, #tpu.memory_space<vmem>>, %arg12: memref<1x128xf32, #tpu.memory_space<vmem>>, %arg13: memref<8x128xf32, #tpu.memory_space<vmem>>) attributes {dimension_semantics = [#tpu.dimension_semantics<arbitrary>], iteration_bounds = array<i64: 1>, scalar_prefetch = 1 : i64, scratch_operands = 1 : i64, tpu.core_type = #tpu.core_type<tc>, window_params = [{transform_indices = @transform_0, window_bounds = array<i64: 1, 8, 128>}, {pipeline_mode = #tpu.pipeline_mode<synchronous>, transform_indices = @transform_1, window_bounds = array<i64: 1, 128>}, {pipeline_mode = #tpu.pipeline_mode<synchronous>, transform_indices = @transform_2, window_bounds = array<i64: 120, 128>}, {pipeline_mode = #tpu.pipeline_mode<synchronous>, transform_indices = @transform_3, window_bounds = array<i64: 128, 32>}, {pipeline_mode = #tpu.pipeline_mode<synchronous>, transform_indices = @transform_4, window_bounds = array<i64: 1, 32>}, {pipeline_mode = #tpu.pipeline_mode<synchronous>, transform_indices = @transform_5, window_bounds = array<i64: 32, 128>}, {pipeline_mode = #tpu.pipeline_mode<synchronous>, transform_indices = @transform_6, window_bounds = array<i64: 1, 128>}, {pipeline_mode = #tpu.pipeline_mode<synchronous>, transform_indices = @transform_7, window_bounds = array<i64: 8, 8>}, {transform_indices = @transform_8, window_bounds = array<i64: 1, 8, 128>}, {pipeline_mode = #tpu.pipeline_mode<synchronous>, transform_indices = @transform_9, window_bounds = array<i64: 120, 128>}, {pipeline_mode = #tpu.pipeline_mode<synchronous>, transform_indices = @transform_10, window_bounds = array<i64: 1, 128>}]} {
    %c0_i32 = arith.constant 0 : i32
    %0 = arith.cmpi eq, %arg0, %c0_i32 : i32
    %1 = arith.extui %0 : i1 to i32
    %c0_i32_0 = arith.constant 0 : i32
    %2 = arith.cmpi ne, %1, %c0_i32_0 : i32
    scf.if %2 {
      %c0_68 = arith.constant 0 : index
      %c0_69 = arith.constant 0 : index
      %106 = vector.load %arg4[%c0_68, %c0_69] : memref<120x128xf32, #tpu.memory_space<vmem>>, vector<120x128xf32>
      %c0_70 = arith.constant 0 : index
      %c0_71 = arith.constant 0 : index
      %107 = vector.load %arg11[%c0_70, %c0_71] : memref<120x128xf32, #tpu.memory_space<vmem>>, vector<120x128xf32>
      tpu.vector_store %arg11[%c0_70, %c0_71], %106 {strides = array<i32>} : memref<120x128xf32, #tpu.memory_space<vmem>>, vector<120x128xf32>,
      %c0_72 = arith.constant 0 : index
      %c0_73 = arith.constant 0 : index
      %108 = vector.load %arg3[%c0_72, %c0_73] : memref<1x128xf32, #tpu.memory_space<vmem>>, vector<1x128xf32>
      %c0_74 = arith.constant 0 : index
      %c0_75 = arith.constant 0 : index
      %109 = vector.load %arg12[%c0_74, %c0_75] : memref<1x128xf32, #tpu.memory_space<vmem>>, vector<1x128xf32>
      tpu.vector_store %arg12[%c0_74, %c0_75], %108 {strides = array<i32>} : memref<1x128xf32, #tpu.memory_space<vmem>>, vector<1x128xf32>,
    } else {
    }
    %c0 = arith.constant 0 : index
    %3 = memref.load %arg1[%c0] : memref<1xi32, #tpu.memory_space<smem>>
    %c120_i32 = arith.constant 120 : i32
    %4 = arith.remsi %3, %c120_i32 : i32
    %c120_i32_1 = arith.constant 120 : i32
    %5 = arith.addi %4, %c120_i32_1 : i32
    %c120_i32_2 = arith.constant 120 : i32
    %6 = arith.remsi %5, %c120_i32_2 : i32
    %c8_i32 = arith.constant 8 : i32
    %7 = arith.muli %arg0, %c8_i32 : i32
    %8 = arith.addi %6, %7 : i32
    %c0_3 = arith.constant 0 : index
    %c0_4 = arith.constant 0 : index
    %c0_5 = arith.constant 0 : index
    %9 = vector.load %arg2[%c0_3, %c0_4, %c0_5] : memref<1x8x128xf32, #tpu.memory_space<vmem>>, vector<1x8x128xf32>
    %10 = vector.shape_cast %9 : vector<1x8x128xf32> to vector<8x128xf32>
    %c0_i32_6 = arith.constant 0 : i32
    %11 = arith.addi %8, %c0_i32_6 : i32
    %c120_i32_7 = arith.constant 120 : i32
    %12 = arith.remsi %11, %c120_i32_7 : i32
    %13 = arith.index_cast %12 : i32 to index
    %c0_8 = arith.constant 0 : index
    %14 = vector.load %arg11[%13, %c0_8] : memref<120x128xf32, #tpu.memory_space<vmem>>, vector<1x128xf32>
    %c0_9 = arith.constant 0 : index
    %c0_10 = arith.constant 0 : index
    %15 = vector.load %arg13[%c0_9, %c0_10] : memref<8x128xf32, #tpu.memory_space<vmem>>, vector<1x128xf32>
    tpu.vector_store %arg13[%c0_9, %c0_10], %14 {strides = array<i32>} : memref<8x128xf32, #tpu.memory_space<vmem>>, vector<1x128xf32>,
    %16 = vector.extract_strided_slice %10 {offsets = [0, 0], sizes = [1, 128], strides = [1, 1]} : vector<8x128xf32> to vector<1x128xf32>
    %17 = arith.index_cast %12 : i32 to index
    %c0_11 = arith.constant 0 : index
    %18 = vector.load %arg11[%17, %c0_11] : memref<120x128xf32, #tpu.memory_space<vmem>>, vector<1x128xf32>
    tpu.vector_store %arg11[%17, %c0_11], %16 {strides = array<i32>} : memref<120x128xf32, #tpu.memory_space<vmem>>, vector<1x128xf32>,
    %c1_i32 = arith.constant 1 : i32
    %19 = arith.addi %8, %c1_i32 : i32
    %c120_i32_12 = arith.constant 120 : i32
    %20 = arith.remsi %19, %c120_i32_12 : i32
    %21 = arith.index_cast %20 : i32 to index
    %c0_13 = arith.constant 0 : index
    %22 = vector.load %arg11[%21, %c0_13] : memref<120x128xf32, #tpu.memory_space<vmem>>, vector<1x128xf32>
    %c1 = arith.constant 1 : index
    %c0_14 = arith.constant 0 : index
    %23 = vector.load %arg13[%c1, %c0_14] : memref<8x128xf32, #tpu.memory_space<vmem>>, vector<1x128xf32>
    tpu.vector_store %arg13[%c1, %c0_14], %22 {strides = array<i32>} : memref<8x128xf32, #tpu.memory_space<vmem>>, vector<1x128xf32>,
    %24 = vector.extract_strided_slice %10 {offsets = [1, 0], sizes = [1, 128], strides = [1, 1]} : vector<8x128xf32> to vector<1x128xf32>
    %25 = arith.index_cast %20 : i32 to index
    %c0_15 = arith.constant 0 : index
    %26 = vector.load %arg11[%25, %c0_15] : memref<120x128xf32, #tpu.memory_space<vmem>>, vector<1x128xf32>
    tpu.vector_store %arg11[%25, %c0_15], %24 {strides = array<i32>} : memref<120x128xf32, #tpu.memory_space<vmem>>, vector<1x128xf32>,
    %c2_i32 = arith.constant 2 : i32
    %27 = arith.addi %8, %c2_i32 : i32
    %c120_i32_16 = arith.constant 120 : i32
    %28 = arith.remsi %27, %c120_i32_16 : i32
    %29 = arith.index_cast %28 : i32 to index
    %c0_17 = arith.constant 0 : index
    %30 = vector.load %arg11[%29, %c0_17] : memref<120x128xf32, #tpu.memory_space<vmem>>, vector<1x128xf32>
    %c2 = arith.constant 2 : index
    %c0_18 = arith.constant 0 : index
    %31 = vector.load %arg13[%c2, %c0_18] : memref<8x128xf32, #tpu.memory_space<vmem>>, vector<1x128xf32>
    tpu.vector_store %arg13[%c2, %c0_18], %30 {strides = array<i32>} : memref<8x128xf32, #tpu.memory_space<vmem>>, vector<1x128xf32>,
    %32 = vector.extract_strided_slice %10 {offsets = [2, 0], sizes = [1, 128], strides = [1, 1]} : vector<8x128xf32> to vector<1x128xf32>
    %33 = arith.index_cast %28 : i32 to index
    %c0_19 = arith.constant 0 : index
    %34 = vector.load %arg11[%33, %c0_19] : memref<120x128xf32, #tpu.memory_space<vmem>>, vector<1x128xf32>
    tpu.vector_store %arg11[%33, %c0_19], %32 {strides = array<i32>} : memref<120x128xf32, #tpu.memory_space<vmem>>, vector<1x128xf32>,
    %c3_i32 = arith.constant 3 : i32
    %35 = arith.addi %8, %c3_i32 : i32
    %c120_i32_20 = arith.constant 120 : i32
    %36 = arith.remsi %35, %c120_i32_20 : i32
    %37 = arith.index_cast %36 : i32 to index
    %c0_21 = arith.constant 0 : index
    %38 = vector.load %arg11[%37, %c0_21] : memref<120x128xf32, #tpu.memory_space<vmem>>, vector<1x128xf32>
    %c3 = arith.constant 3 : index
    %c0_22 = arith.constant 0 : index
    %39 = vector.load %arg13[%c3, %c0_22] : memref<8x128xf32, #tpu.memory_space<vmem>>, vector<1x128xf32>
    tpu.vector_store %arg13[%c3, %c0_22], %38 {strides = array<i32>} : memref<8x128xf32, #tpu.memory_space<vmem>>, vector<1x128xf32>,
    %40 = vector.extract_strided_slice %10 {offsets = [3, 0], sizes = [1, 128], strides = [1, 1]} : vector<8x128xf32> to vector<1x128xf32>
    %41 = arith.index_cast %36 : i32 to index
    %c0_23 = arith.constant 0 : index
    %42 = vector.load %arg11[%41, %c0_23] : memref<120x128xf32, #tpu.memory_space<vmem>>, vector<1x128xf32>
    tpu.vector_store %arg11[%41, %c0_23], %40 {strides = array<i32>} : memref<120x128xf32, #tpu.memory_space<vmem>>, vector<1x128xf32>,
    %c4_i32 = arith.constant 4 : i32
    %43 = arith.addi %8, %c4_i32 : i32
    %c120_i32_24 = arith.constant 120 : i32
    %44 = arith.remsi %43, %c120_i32_24 : i32
    %45 = arith.index_cast %44 : i32 to index
    %c0_25 = arith.constant 0 : index
    %46 = vector.load %arg11[%45, %c0_25] : memref<120x128xf32, #tpu.memory_space<vmem>>, vector<1x128xf32>
    %c4 = arith.constant 4 : index
    %c0_26 = arith.constant 0 : index
    %47 = vector.load %arg13[%c4, %c0_26] : memref<8x128xf32, #tpu.memory_space<vmem>>, vector<1x128xf32>
    tpu.vector_store %arg13[%c4, %c0_26], %46 {strides = array<i32>} : memref<8x128xf32, #tpu.memory_space<vmem>>, vector<1x128xf32>,
    %48 = vector.extract_strided_slice %10 {offsets = [4, 0], sizes = [1, 128], strides = [1, 1]} : vector<8x128xf32> to vector<1x128xf32>
    %49 = arith.index_cast %44 : i32 to index
    %c0_27 = arith.constant 0 : index
    %50 = vector.load %arg11[%49, %c0_27] : memref<120x128xf32, #tpu.memory_space<vmem>>, vector<1x128xf32>
    tpu.vector_store %arg11[%49, %c0_27], %48 {strides = array<i32>} : memref<120x128xf32, #tpu.memory_space<vmem>>, vector<1x128xf32>,
    %c5_i32 = arith.constant 5 : i32
    %51 = arith.addi %8, %c5_i32 : i32
    %c120_i32_28 = arith.constant 120 : i32
    %52 = arith.remsi %51, %c120_i32_28 : i32
    %53 = arith.index_cast %52 : i32 to index
    %c0_29 = arith.constant 0 : index
    %54 = vector.load %arg11[%53, %c0_29] : memref<120x128xf32, #tpu.memory_space<vmem>>, vector<1x128xf32>
    %c5 = arith.constant 5 : index
    %c0_30 = arith.constant 0 : index
    %55 = vector.load %arg13[%c5, %c0_30] : memref<8x128xf32, #tpu.memory_space<vmem>>, vector<1x128xf32>
    tpu.vector_store %arg13[%c5, %c0_30], %54 {strides = array<i32>} : memref<8x128xf32, #tpu.memory_space<vmem>>, vector<1x128xf32>,
    %56 = vector.extract_strided_slice %10 {offsets = [5, 0], sizes = [1, 128], strides = [1, 1]} : vector<8x128xf32> to vector<1x128xf32>
    %57 = arith.index_cast %52 : i32 to index
    %c0_31 = arith.constant 0 : index
    %58 = vector.load %arg11[%57, %c0_31] : memref<120x128xf32, #tpu.memory_space<vmem>>, vector<1x128xf32>
    tpu.vector_store %arg11[%57, %c0_31], %56 {strides = array<i32>} : memref<120x128xf32, #tpu.memory_space<vmem>>, vector<1x128xf32>,
    %c6_i32 = arith.constant 6 : i32
    %59 = arith.addi %8, %c6_i32 : i32
    %c120_i32_32 = arith.constant 120 : i32
    %60 = arith.remsi %59, %c120_i32_32 : i32
    %61 = arith.index_cast %60 : i32 to index
    %c0_33 = arith.constant 0 : index
    %62 = vector.load %arg11[%61, %c0_33] : memref<120x128xf32, #tpu.memory_space<vmem>>, vector<1x128xf32>
    %c6 = arith.constant 6 : index
    %c0_34 = arith.constant 0 : index
    %63 = vector.load %arg13[%c6, %c0_34] : memref<8x128xf32, #tpu.memory_space<vmem>>, vector<1x128xf32>
    tpu.vector_store %arg13[%c6, %c0_34], %62 {strides = array<i32>} : memref<8x128xf32, #tpu.memory_space<vmem>>, vector<1x128xf32>,
    %64 = vector.extract_strided_slice %10 {offsets = [6, 0], sizes = [1, 128], strides = [1, 1]} : vector<8x128xf32> to vector<1x128xf32>
    %65 = arith.index_cast %60 : i32 to index
    %c0_35 = arith.constant 0 : index
    %66 = vector.load %arg11[%65, %c0_35] : memref<120x128xf32, #tpu.memory_space<vmem>>, vector<1x128xf32>
    tpu.vector_store %arg11[%65, %c0_35], %64 {strides = array<i32>} : memref<120x128xf32, #tpu.memory_space<vmem>>, vector<1x128xf32>,
    %c7_i32 = arith.constant 7 : i32
    %67 = arith.addi %8, %c7_i32 : i32
    %c120_i32_36 = arith.constant 120 : i32
    %68 = arith.remsi %67, %c120_i32_36 : i32
    %69 = arith.index_cast %68 : i32 to index
    %c0_37 = arith.constant 0 : index
    %70 = vector.load %arg11[%69, %c0_37] : memref<120x128xf32, #tpu.memory_space<vmem>>, vector<1x128xf32>
    %c7 = arith.constant 7 : index
    %c0_38 = arith.constant 0 : index
    %71 = vector.load %arg13[%c7, %c0_38] : memref<8x128xf32, #tpu.memory_space<vmem>>, vector<1x128xf32>
    tpu.vector_store %arg13[%c7, %c0_38], %70 {strides = array<i32>} : memref<8x128xf32, #tpu.memory_space<vmem>>, vector<1x128xf32>,
    %72 = vector.extract_strided_slice %10 {offsets = [7, 0], sizes = [1, 128], strides = [1, 1]} : vector<8x128xf32> to vector<1x128xf32>
    %73 = arith.index_cast %68 : i32 to index
    %c0_39 = arith.constant 0 : index
    %74 = vector.load %arg11[%73, %c0_39] : memref<120x128xf32, #tpu.memory_space<vmem>>, vector<1x128xf32>
    tpu.vector_store %arg11[%73, %c0_39], %72 {strides = array<i32>} : memref<120x128xf32, #tpu.memory_space<vmem>>, vector<1x128xf32>,
    %c0_40 = arith.constant 0 : index
    %c0_41 = arith.constant 0 : index
    %75 = vector.load %arg13[%c0_40, %c0_41] : memref<8x128xf32, #tpu.memory_space<vmem>>, vector<8x128xf32>
    %76 = arith.subf %10, %75 : vector<8x128xf32>
    %c0_42 = arith.constant 0 : index
    %c0_43 = arith.constant 0 : index
    %77 = vector.load %arg12[%c0_42, %c0_43] : memref<1x128xf32, #tpu.memory_space<vmem>>, vector<1x128xf32>
    %c0_44 = arith.constant 0 : index
    %c0_45 = arith.constant 0 : index
    %78 = vector.load %arg5[%c0_44, %c0_45] : memref<128x32xf32, #tpu.memory_space<vmem>>, vector<128x32xf32>
    %cst = arith.constant dense<0.000000e+00> : vector<1x32xf32>
    %79 = tpu.matmul %77, %78, %cst {dimension_numbers = #tpu.dot_dimension_numbers<[1], [0], [0], [1], [0, 0, 1, 1], [], []>} : vector<1x128xf32>, vector<128x32xf32>, vector<1x32xf32> -> vector<1x32xf32>
    %c0_46 = arith.constant 0 : index
    %c0_47 = arith.constant 0 : index
    %80 = vector.load %arg6[%c0_46, %c0_47] : memref<1x32xf32, #tpu.memory_space<vmem>>, vector<1x32xf32>
    %81 = arith.addf %79, %80 : vector<1x32xf32>
    %c0_48 = arith.constant 0 : index
    %c0_49 = arith.constant 0 : index
    %82 = vector.load %arg5[%c0_48, %c0_49] : memref<128x32xf32, #tpu.memory_space<vmem>>, vector<128x32xf32>
    %cst_50 = arith.constant dense<0.000000e+00> : vector<8x32xf32>
    %83 = tpu.matmul %76, %82, %cst_50 {dimension_numbers = #tpu.dot_dimension_numbers<[1], [0], [0], [1], [0, 0, 1, 1], [], []>} : vector<8x128xf32>, vector<128x32xf32>, vector<8x32xf32> -> vector<8x32xf32>
    %c0_51 = arith.constant 0 : index
    %c0_52 = arith.constant 0 : index
    %84 = vector.load %arg9[%c0_51, %c0_52] : memref<8x8xf32, #tpu.memory_space<vmem>>, vector<8x8xf32>
    %cst_53 = arith.constant dense<0.000000e+00> : vector<8x32xf32>
    %85 = tpu.matmul %84, %83, %cst_53 {dimension_numbers = #tpu.dot_dimension_numbers<[1], [0], [0], [1], [0, 0, 1, 1], [], []>} : vector<8x8xf32>, vector<8x32xf32>, vector<8x32xf32> -> vector<8x32xf32>
    %86 = vector.broadcast %81 : vector<1x32xf32> to vector<8x32xf32>
    %87 = arith.addf %86, %85 : vector<8x32xf32>
    %cst_54 = arith.constant 0.000000e+00 : f32
    %88 = vector.broadcast %cst_54 : f32 to vector<8x32xf32>
    %89 = arith.maximumf %87, %88 : vector<8x32xf32>
    %cst_55 = arith.constant dense<0.000000e+00> : vector<32xf32>
    %90 = vector.multi_reduction <add>, %89, %cst_55 [0] : vector<8x32xf32> to vector<32xf32>
    %91 = vector.shape_cast %90 : vector<32xf32> to vector<1x32xf32>
    %cst_56 = arith.constant 1.250000e-01 : f32
    %92 = vector.broadcast %cst_56 : f32 to vector<1x32xf32>
    %93 = arith.mulf %91, %92 : vector<1x32xf32>
    %c0_57 = arith.constant 0 : index
    %c0_58 = arith.constant 0 : index
    %94 = vector.load %arg7[%c0_57, %c0_58] : memref<32x128xf32, #tpu.memory_space<vmem>>, vector<32x128xf32>
    %cst_59 = arith.constant dense<0.000000e+00> : vector<1x128xf32>
    %95 = tpu.matmul %93, %94, %cst_59 {dimension_numbers = #tpu.dot_dimension_numbers<[1], [0], [0], [1], [0, 0, 1, 1], [], []>} : vector<1x32xf32>, vector<32x128xf32>, vector<1x128xf32> -> vector<1x128xf32>
    %c0_60 = arith.constant 0 : index
    %c0_61 = arith.constant 0 : index
    %96 = vector.load %arg8[%c0_60, %c0_61] : memref<1x128xf32, #tpu.memory_space<vmem>>, vector<1x128xf32>
    %97 = arith.addf %95, %96 : vector<1x128xf32>
    %98 = vector.shape_cast %97 : vector<1x128xf32> to vector<1x1x128xf32>
    %99 = vector.shape_cast %98 : vector<1x1x128xf32> to vector<1x1x128xf32>
    %100 = vector.broadcast %99 : vector<1x1x128xf32> to vector<1x8x128xf32>
    %c0_62 = arith.constant 0 : index
    %c0_63 = arith.constant 0 : index
    %c0_64 = arith.constant 0 : index
    %101 = vector.load %arg10[%c0_62, %c0_63, %c0_64] : memref<1x8x128xf32, #tpu.memory_space<vmem>>, vector<1x8x128xf32>
    tpu.vector_store %arg10[%c0_62, %c0_63, %c0_64], %100 {strides = array<i32>} : memref<1x8x128xf32, #tpu.memory_space<vmem>>, vector<1x8x128xf32>,
    %cst_65 = arith.constant dense<0.000000e+00> : vector<128xf32>
    %102 = vector.multi_reduction <add>, %76, %cst_65 [0] : vector<8x128xf32> to vector<128xf32>
    %103 = vector.shape_cast %102 : vector<128xf32> to vector<1x128xf32>
    %104 = arith.addf %77, %103 : vector<1x128xf32>
    %c0_66 = arith.constant 0 : index
    %c0_67 = arith.constant 0 : index
    %105 = vector.load %arg12[%c0_66, %c0_67] : memref<1x128xf32, #tpu.memory_space<vmem>>, vector<1x128xf32>
    tpu.vector_store %arg12[%c0_66, %c0_67], %104 {strides = array<i32>} : memref<1x128xf32, #tpu.memory_space<vmem>>, vector<1x128xf32>,
    return
  }
  func.func @transform_0(%arg0: i32, %arg1: memref<1xi32, #tpu.memory_space<smem>>) -> (i32, i32, i32) {
    %c0_i32 = arith.constant 0 : i32
    %c0_i32_0 = arith.constant 0 : i32
    %c0_i32_1 = arith.constant 0 : i32
    return %arg0, %c0_i32, %c0_i32_0 : i32, i32, i32
  }
  func.func @transform_1(%arg0: i32, %arg1: memref<1xi32, #tpu.memory_space<smem>>) -> (i32, i32) {
    %c0_i32 = arith.constant 0 : i32
    %c0_i32_0 = arith.constant 0 : i32
    %c0_i32_1 = arith.constant 0 : i32
    return %c0_i32, %c0_i32_0 : i32, i32
  }
  func.func @transform_2(%arg0: i32, %arg1: memref<1xi32, #tpu.memory_space<smem>>) -> (i32, i32) {
    %c0_i32 = arith.constant 0 : i32
    %c0_i32_0 = arith.constant 0 : i32
    %c0_i32_1 = arith.constant 0 : i32
    return %c0_i32, %c0_i32_0 : i32, i32
  }
  func.func @transform_3(%arg0: i32, %arg1: memref<1xi32, #tpu.memory_space<smem>>) -> (i32, i32) {
    %c0_i32 = arith.constant 0 : i32
    %c0_i32_0 = arith.constant 0 : i32
    %c0_i32_1 = arith.constant 0 : i32
    return %c0_i32, %c0_i32_0 : i32, i32
  }
  func.func @transform_4(%arg0: i32, %arg1: memref<1xi32, #tpu.memory_space<smem>>) -> (i32, i32) {
    %c0_i32 = arith.constant 0 : i32
    %c0_i32_0 = arith.constant 0 : i32
    %c0_i32_1 = arith.constant 0 : i32
    return %c0_i32, %c0_i32_0 : i32, i32
  }
  func.func @transform_5(%arg0: i32, %arg1: memref<1xi32, #tpu.memory_space<smem>>) -> (i32, i32) {
    %c0_i32 = arith.constant 0 : i32
    %c0_i32_0 = arith.constant 0 : i32
    %c0_i32_1 = arith.constant 0 : i32
    return %c0_i32, %c0_i32_0 : i32, i32
  }
  func.func @transform_6(%arg0: i32, %arg1: memref<1xi32, #tpu.memory_space<smem>>) -> (i32, i32) {
    %c0_i32 = arith.constant 0 : i32
    %c0_i32_0 = arith.constant 0 : i32
    %c0_i32_1 = arith.constant 0 : i32
    return %c0_i32, %c0_i32_0 : i32, i32
  }
  func.func @transform_7(%arg0: i32, %arg1: memref<1xi32, #tpu.memory_space<smem>>) -> (i32, i32) {
    %c0_i32 = arith.constant 0 : i32
    %c0_i32_0 = arith.constant 0 : i32
    %c0_i32_1 = arith.constant 0 : i32
    return %c0_i32, %c0_i32_0 : i32, i32
  }
  func.func @transform_8(%arg0: i32, %arg1: memref<1xi32, #tpu.memory_space<smem>>) -> (i32, i32, i32) {
    %c0_i32 = arith.constant 0 : i32
    %c0_i32_0 = arith.constant 0 : i32
    %c0_i32_1 = arith.constant 0 : i32
    return %arg0, %c0_i32, %c0_i32_0 : i32, i32, i32
  }
  func.func @transform_9(%arg0: i32, %arg1: memref<1xi32, #tpu.memory_space<smem>>) -> (i32, i32) {
    %c0_i32 = arith.constant 0 : i32
    %c0_i32_0 = arith.constant 0 : i32
    %c0_i32_1 = arith.constant 0 : i32
    return %c0_i32, %c0_i32_0 : i32, i32
  }
  func.func @transform_10(%arg0: i32, %arg1: memref<1xi32, #tpu.memory_space<smem>>) -> (i32, i32) {
    %c0_i32 = arith.constant 0 : i32
    %c0_i32_0 = arith.constant 0 : i32
    %c0_i32_1 = arith.constant 0 : i32
    return %c0_i32, %c0_i32_0 : i32, i32
  }
}

</mosaic_0001>

<bundles_post_ra>
// kernel: decoder_measure_forward.1
= control target key start
LH: loop header
LB: loop body
LE: loop exit
PB: predicated region body
PF: predicated region fallthrough
CT: control target
= control target key end

     0   :  { %18 = vsyncpa [#allocation6], 0  ;;  %v838_v3 = vmov 0.0|0.0   ;;  %vm839_vm0 = vmmov 0   ;;  %v840_v6 = vmov 0.0   ;;  %s1154_s0 = inlined_call_operand.<no memory space> [shape: s32[1], index: 0, kind: input, shape index: {}]   ;;  %s1155_s1 = inlined_call_operand.vmem [shape: f32[1,8,128], index: 1, kind: input, shape index: {}]   ;;  %s1156_s2 = inlined_call_operand.vmem [shape: f32[1,128], index: 2, kind: input, shape index: {}]   ;;  %s1157_s3 = inlined_call_operand.vmem [shape: f32[120,128], index: 3, kind: input, shape index: {}]   ;;  %s1158_s4 = inlined_call_operand.vmem [shape: f32[128,32], index: 4, kind: input, shape index: {}]   ;;  %s1159_s5 = inlined_call_operand.vmem [shape: f32[1,32], index: 5, kind: input, shape index: {}]   ;;  %s1160_s6 = inlined_call_operand.vmem [shape: f32[32,128], index: 6, kind: input, shape index: {}]   ;;  %s1161_s7 = inlined_call_operand.vmem [shape: f32[1,128], index: 7, kind: input, shape index: {}]   ;;  %s1162_s8 = inlined_call_operand.vmem [shape: f32[8,8], index: 8, kind: input, shape index: {}]   ;;  %s1163_s9 = inlined_call_operand.vmem [shape: f32[1,8,128], index: 9, kind: output, shape index: {0}]   ;;  %s1164_s10 = inlined_call_operand.hbm [shape: f32[120,128], index: 10, kind: output, shape index: {1}]   ;;  %s1165_s11 = inlined_call_operand.hbm [shape: f32[1,128], index: 11, kind: output, shape index: {2}]  }
   0x1   :  { %v189_v0 = vld [vmem:[%s1158_s4] sm:$0xff]  ;;  %v190_v1 = vld [vmem:[%s1158_s4 + $0x8] sm:$0xff]  ;;  %v191_v2 = vld [vmem:[%s1158_s4 + $0x10] sm:$0xff]  ;;  %732 = vmatprep.subr.bf16.mxu1 %v838_v3  ;;  %689 = vmatprep.mubr.msk.f32.mxu1 %vm839_vm0, %v840_v6  ;;  %s74_s27 = ssub.s32 0, %s1154_s0  ;;  %p73_p0 = scmp.lt.s32.totalorder %s1154_s0, 0 }
   0x2   :  { %v709_v4 = vpack.c.bf16 %v190_v1, %v189_v0  ;;  %v192_v5 = vld [vmem:[%s1158_s4 + $0x18] sm:$0xff]  ;;  %s569_s30 = smin.u32 %s74_s27, %s1154_s0  ;;  %708 = vmatprep.subr.bf16.mxu0 %v838_v3  ;;  %654 = vmatprep.mubr.msk.f32.mxu0 %vm839_vm0, %v840_v6  ;;  %v193_v8 = vld [vmem:[%s1158_s4 + $0x20] sm:$0xff]  ;;  %v194_v9 = vld [vmem:[%s1158_s4 + $0x28] sm:$0xff] }
   0x3   :  { %v712_v7 = vpack.c.bf16 %v192_v5, %v191_v2  ;;  %770 = sdivrem.u32 %s569_s30, 120  ;;  %v40_v10 = vld [vmem:[%s1157_s3] sm:$0xff]  ;;  %v41_v11 = vld [vmem:[%s1157_s3 + $0x8] sm:$0xff]  ;;  %v195_v12 = vld [vmem:[%s1158_s4 + $0x30] sm:$0xff]  ;;  %v715_v17 = vpack.c.bf16 %v194_v9, %v193_v8 }
   0x4   :  { %734 = vmatpush3.bf16.msra.mxu1 %v709_v4  ;;  %710 = vmatpush3.bf16.msra.mxu0 %v709_v4  ;;  %v196_v13 = vld [vmem:[%s1158_s4 + $0x38] sm:$0xff]  ;;  %v42_v14 = vld [vmem:[%s1157_s3 + $0x10] sm:$0xff]  ;;  %v44_v16 = vld [vmem:[%s1157_s3 + $0x20] sm:$0xff]  ;;  %55 = vst [vmem:[#allocation5] sm:$0xff] %v40_v10 }
   0x5   :  { %735 = vmatprep.subr.bf16.mxu1 %v838_v3  ;;  %711 = vmatprep.subr.bf16.mxu0 %v838_v3  ;;  %v43_v15 = vld [vmem:[%s1157_s3 + $0x18] sm:$0xff]  ;;  %56 = vst [vmem:[#allocation5 + $0x8] sm:$0xff] %v41_v11  ;;  %v45_v18 = vld [vmem:[%s1157_s3 + $0x28] sm:$0xff]  ;;  %v46_v19 = vld [vmem:[%s1157_s3 + $0x30] sm:$0xff]  ;;  %v718_v29 = vpack.c.bf16 %v196_v13, %v195_v12 }
   0x6   :  { %v47_v20 = vld [vmem:[%s1157_s3 + $0x38] sm:$0xff]  ;;  %57 = vst [vmem:[#allocation5 + $0x10] sm:$0xff] %v42_v14  ;;  %58 = vst [vmem:[#allocation5 + $0x18] sm:$0xff] %v43_v15  ;;  %v48_v21 = vld [vmem:[%s1157_s3 + $0x40] sm:$0xff] }
   0x7   :  { %59 = vst [vmem:[#allocation5 + $0x20] sm:$0xff] %v44_v16  ;;  %v49_v22 = vld [vmem:[%s1157_s3 + $0x48] sm:$0xff]  ;;  %v50_v23 = vld [vmem:[%s1157_s3 + $0x50] sm:$0xff]  ;;  %60 = vst [vmem:[#allocation5 + $0x28] sm:$0xff] %v45_v18 }
   0x8   :  { %737 = vmatpush3.bf16.msra.mxu1 %v712_v7  ;;  %713 = vmatpush3.bf16.msra.mxu0 %v712_v7  ;;  %61 = vst [vmem:[#allocation5 + $0x30] sm:$0xff] %v46_v19  ;;  %62 = vst [vmem:[#allocation5 + $0x38] sm:$0xff] %v47_v20  ;;  %v51_v24 = vld [vmem:[%s1157_s3 + $0x58] sm:$0xff]  ;;  %v52_v25 = vld [vmem:[%s1157_s3 + $0x60] sm:$0xff] }
   0x9   :  { %738 = vmatprep.subr.bf16.mxu1 %v838_v3  ;;  %714 = vmatprep.subr.bf16.mxu0 %v838_v3  ;;  %v53_v26 = vld [vmem:[%s1157_s3 + $0x68] sm:$0xff]  ;;  %63 = vst [vmem:[#allocation5 + $0x40] sm:$0xff] %v48_v21  ;;  %64 = vst [vmem:[#allocation5 + $0x48] sm:$0xff] %v49_v22  ;;  %v54_v27 = vld [vmem:[%s1157_s3 + $0x70] sm:$0xff] }
   0xa   :  { %65 = vst [vmem:[#allocation5 + $0x50] sm:$0xff] %v50_v23  ;;  %66 = vst [vmem:[#allocation5 + $0x58] sm:$0xff] %v51_v24  ;;  %v70_v28 = vld [vmem:[%s1156_s2] sm:$0x1] }
   0xb   :  { %67 = vst [vmem:[#allocation5 + $0x60] sm:$0xff] %v52_v25  ;;  %68 = vst [vmem:[#allocation5 + $0x68] sm:$0xff] %v53_v26 }
   0xc   :  { %740 = vmatpush3.bf16.msra.mxu1 %v715_v17  ;;  %69 = vst [vmem:[#allocation5 + $0x70] sm:$0xff] %v54_v27  ;;  %716 = vmatpush3.bf16.msra.mxu0 %v715_v17  ;;  %71 = vst [vmem:[#allocation7] sm:$0x1] %v70_v28 }
   0xd   :  { %19 = vsyncpa [#allocation8], 0  ;;  %741 = vmatprep.subr.bf16.mxu1 %v838_v3  ;;  %v197_v30 = vld [vmem:[%s1158_s4 + $0x40] sm:$0xff]  ;;  %v198_v31 = vld [vmem:[%s1158_s4 + $0x48] sm:$0xff]  ;;  %s771_s19 = spop.drf %770  ;;  %717 = vmatprep.subr.bf16.mxu0 %v838_v3  ;;  %vm347_vm1 = vcmask 64512   ;;  %v421_v9 = vlaneseq  ;;  %vm427_vm2 = vcmask 261120  }
   0xe   :  { %s78_s2 = ssub.s32 0, %s771_s19  ;;  %v721_v32 = vpack.c.bf16 %v198_v31, %v197_v30  ;;  %v199_v33 = vld [vmem:[%s1158_s4 + $0x50] sm:$0xff]  ;;  %v200_v34 = vld [vmem:[%s1158_s4 + $0x58] sm:$0xff]  ;;  %v201_v36 = vld [vmem:[%s1158_s4 + $0x60] sm:$0xff] }
   0xf   :  { %s1167_s2 = smov (!%p73_p0, %s78_s2), %s771_s19  ;;  %v724_v35 = vpack.c.bf16 %v200_v34, %v199_v33  ;;  %v202_v37 = vld [vmem:[%s1158_s4 + $0x68] sm:$0xff]  ;;  %v203_v39 = vld [vmem:[%s1158_s4 + $0x70] sm:$0xff]  ;;  %v204_v40 = vld [vmem:[%s1158_s4 + $0x78] sm:$0xff]  ;;  %v422_v10 = vshrl.u32 %v421_v9, 7 }
  0x10   :  { %743 = vmatpush3.bf16.msra.mxu1 %v718_v29  ;;  %719 = vmatpush3.bf16.msra.mxu0 %v718_v29  ;;  %s80_s26 = sadd.s32 120, %s1167_s2  ;;  %v727_v38 = vpack.c.bf16 %v202_v37, %v201_v36  ;;  %v730_v41 = vpack.c.bf16 %v204_v40, %v203_v39  ;;  %v1069_v43 = vld [vmem:[%s1155_s1] sm:$0xff]  ;;  %v437_v4 = vld [vmem:[%s1160_s6 + $0x8] sm:$0xff]  ;;  %v438_v5 = vld [vmem:[%s1160_s6 + $0x10] sm:$0xff] }
  0x11   :  { %744 = vmatprep.subr.bf16.mxu1 %v838_v3  ;;  %720 = vmatprep.subr.bf16.mxu0 %v838_v3  ;;  %s82_s27 = ssub.s32 0, %s80_s26  ;;  %p81_p1 = scmp.lt.s32.totalorder %s80_s26, 0  ;;  %v346_v63 = vld [vmem:[%s1162_s8] sm:$0xff]  ;;  %v439_v7 = vld [vmem:[%s1160_s6 + $0x18] sm:$0xff]  ;;  %v423_v13 = vsub.s32 0, %v422_v10 }
  0x12   :  { %s570_s28 = smin.u32 %s82_s27, %s80_s26  ;;  %v436_v2 = vld [vmem:[%s1160_s6] sm:$0xff]  ;;  %v760_v8 = vpack.c.bf16 %v439_v7, %v438_v5  ;;  %s841_s6 = smov [#allocation5]  }
  0x13   :  { %772 = sdivrem.u32 %s570_s28, 120  ;;  %v1043_v42 = vld [vmem:[#allocation7] sm:$0x1] }
  0x14   :  { %746 = vmatpush3.bf16.msra.mxu1 %v721_v32  ;;  %722 = vmatpush3.bf16.msra.mxu0 %v721_v32  ;;  %v205_v11 = vld [vmem:[%s1159_s5] sm:$0x1] }
  0x15   :  { %747 = vmatprep.subr.bf16.mxu1 %v838_v3  ;;  %723 = vmatprep.subr.bf16.mxu0 %v838_v3 }
  0x18   :  { %749 = vmatpush3.bf16.msra.mxu1 %v724_v35  ;;  %725 = vmatpush3.bf16.msra.mxu0 %v724_v35 }
  0x19   :  { %750 = vmatprep.subr.bf16.mxu1 %v838_v3  ;;  %726 = vmatprep.subr.bf16.mxu0 %v838_v3 }
  0x1c   :  { %752 = vmatpush3.bf16.msra.mxu1 %v727_v38  ;;  %728 = vmatpush3.bf16.msra.mxu0 %v727_v38  ;;  %s773_s16 = spop.drf %772 }
  0x1d   :  { %753 = vmatprep.subr.bf16.mxu1 %v838_v3  ;;  %729 = vmatprep.subr.bf16.mxu0 %v838_v3  ;;  %s86_s17 = ssub.s32 0, %s773_s16 }
  0x1e   :  { %s1169_s17 = smov (!%p81_p1, %s86_s17), %s773_s16 }
  0x1f   :  { %s92_s4 = ssub.s32 0, %s1169_s17  ;;  %s1041_s19 = sadd.s32 1, %s1169_s17 }
  0x20   :  { %755 = vmatpush3.bf16.msra.mxu1 %v730_v41  ;;  %731 = vmatpush3.bf16.msra.mxu0 %v730_v41  ;;  %s571_s18 = smin.u32 %s92_s4, %s1169_s17  ;;  %s104_s2 = ssub.s32 0, %s1041_s19 }
  0x21   :  { %692 = vmatprep.subr.mxu0 %v840_v6  ;;  %756 = vmatprep.subr.bf16.mxu1 %v838_v3  ;;  %774 = sdivrem.u32 %s571_s18, 120  ;;  %s1048_s20 = sadd.s32 2, %s1169_s17 }
  0x22   :  { %s572_s21 = smin.u32 %s104_s2, %s1041_s19  ;;  %s116_s22 = ssub.s32 0, %s1048_s20 }
  0x23   :  { %655 = vmatmul.mubr.f32.vlgmr.msra.gmra.mrb[0].mxu0 %v1043_v42  ;;  %776 = sdivrem.u32 %s572_s21, 120  ;;  %s573_s23 = smin.u32 %s116_s22, %s1048_s20 }
  0x24   :  { %694 = vmatprep.mubr.msk.f32.mxu0 %vm839_vm0, %v840_v6  ;;  %s1056_s24 = sadd.s32 3, %s1169_s17  ;;  %778 = sdivrem.u32 %s573_s23, 120 }
  0x25   :  { %s128_s25 = ssub.s32 0, %s1056_s24  ;;  %s1060_s26 = sadd.s32 4, %s1169_s17 }
  0x26   :  { %p91_p2 = scmp.lt.s32.totalorder %s1169_s17, 0  ;;  %s574_s27 = smin.u32 %s128_s25, %s1056_s24 }
  0x27   :  { %780 = sdivrem.u32 %s574_s27, 120  ;;  %s140_s28 = ssub.s32 0, %s1060_s26 }
  0x28   :  { %s575_s29 = smin.u32 %s140_s28, %s1060_s26  ;;  %p103_p3 = scmp.lt.s32.totalorder %s1041_s19, 0 }
  0x29   :  { %782 = sdivrem.u32 %s575_s29, 120  ;;  %s1074_s16 = sadd.s32 5, %s1169_s17 }
  0x2a   :  { %s775_s0 = spop.drf %774  ;;  %s152_s4 = ssub.s32 0, %s1074_s16 }
  0x2b   :  { %s96_s30 = ssub.s32 0, %s775_s0  ;;  %s576_s1 = smin.u32 %s152_s4, %s1074_s16 }
  0x2c   :  { %s1171_s30 = smov (!%p91_p2, %s96_s30), %s775_s0  ;;  %s777_s14 = spop.drf %776 }
  0x2d   :  { %s98_s15 = scalar_lea.vmem [#allocation5], %s1171_s30  ;;  %s108_s3 = ssub.s32 0, %s777_s14 }
  0x2e   :  { %v99_v44 = vld [vmem:[%s98_s15] sm:$0x1]  ;;  %s1173_s3 = smov (!%p103_p3, %s108_s3), %s777_s14  ;;  %s779_s18 = spop.drf %778 }
  0x2f   :  { %100 = vst [vmem:[#allocation2] sm:$0x1] %v99_v44  ;;  %101 = vst [vmem:[%s98_s15] sm:$0x1] %v1069_v43  ;;  %s110_s2 = scalar_lea.vmem [#allocation5], %s1173_s3  ;;  %s120_s21 = ssub.s32 0, %s779_s18 }
  0x30   :  { %p115_p4 = scmp.lt.s32.totalorder %s1048_s20, 0  ;;  %784 = sdivrem.u32 %s576_s1, 120 }
  0x31   :  { %s1081_s22 = sadd.s32 6, %s1169_s17  ;;  %s1085_s23 = sadd.s32 7, %s1169_s17 }
  0x32   :  { %s1175_s21 = smov (!%p115_p4, %s120_s21), %s779_s18  ;;  %s164_s19 = ssub.s32 0, %s1081_s22 }
  0x33   :  { %s781_s25 = spop.drf %780  ;;  %s577_s27 = smin.u32 %s164_s19, %s1081_s22 }
  0x34   :  { %786 = sdivrem.u32 %s577_s27, 120  ;;  %s176_s28 = ssub.s32 0, %s1085_s23 }
  0x35   :  { %s578_s0 = smin.u32 %s176_s28, %s1085_s23  ;;  %s122_s29 = scalar_lea.vmem [#allocation5], %s1175_s21 }
  0x36   :  { %v111_v45 = vld [vmem:[%s110_s2] sm:$0x1]  ;;  %s132_s20 = ssub.s32 0, %s781_s25  ;;  %788 = sdivrem.u32 %s578_s0, 120 }
  0x37   :  { %112 = vst [vmem:[#allocation2 + $0x1] sm:$0x1] %v111_v45  ;;  %113 = vst [vmem:[%s110_s2 - $0x1] sm:$0x2] %v1069_v43  ;;  %p127_p5 = scmp.lt.s32.totalorder %s1056_s24, 0  ;;  %s783_s17 = spop.drf %782 }
  0x38   :  { %s144_s12 = ssub.s32 0, %s783_s17  ;;  %p139_p6 = scmp.lt.s32.totalorder %s1060_s26, 0 }
  0x39   :  { %s1177_s20 = smov (!%p127_p5, %s132_s20), %s781_s25  ;;  %s785_s13 = spop.drf %784 }
  0x3a   :  { %s134_s30 = scalar_lea.vmem [#allocation5], %s1177_s20  ;;  %s1179_s12 = smov (!%p139_p6, %s144_s12), %s783_s17 }
  0x3b   :  { %s146_s14 = scalar_lea.vmem [#allocation5], %s1179_s12  ;;  %s156_s15 = ssub.s32 0, %s785_s13 }
  0x3c   :  { %p151_p7 = scmp.lt.s32.totalorder %s1074_s16, 0  ;;  %p163_p8 = scmp.lt.s32.totalorder %s1081_s22, 0 }
  0x3d   :  { %s787_s24 = spop.drf %786  ;;  %p175_p9 = scmp.lt.s32.totalorder %s1085_s23, 0 }
  0x3e   :  { %v123_v46 = vld [vmem:[%s122_s29] sm:$0x1]  ;;  %s1181_s15 = smov (!%p151_p7, %s156_s15), %s785_s13  ;;  %s168_s4 = ssub.s32 0, %s787_s24 }
  0x3f   :  { %124 = vst [vmem:[#allocation2 + $0x2] sm:$0x1] %v123_v46  ;;  %125 = vst [vmem:[%s122_s29 - $0x2] sm:$0x4] %v1069_v43  ;;  %s158_s3 = scalar_lea.vmem [#allocation5], %s1181_s15  ;;  %s1183_s4 = smov (!%p163_p8, %s168_s4), %s787_s24 }
  0x40   :  { %s789_s26 = spop.drf %788  ;;  %s170_s18 = scalar_lea.vmem [#allocation5], %s1183_s4 }
  0x41   :  { %s180_s1 = ssub.s32 0, %s789_s26  ;;  %s534_s17 = sshll.u32 %s841_s6, 4  ;;  %s535_s17 = int_to_ptr.vmem [resolvable:$true] %s534_s17 }
  0x42   :  { %s1185_s1 = smov (!%p175_p9, %s180_s1), %s789_s26  ;;  %s790_s5 = scalar_lea.vmem %s535_s17, 1920 }
  0x43   :  { %s182_s16 = scalar_lea.vmem [#allocation5], %s1185_s1  ;;  %p791_p10 = scmp.ne.s32.totalorder %s535_s17, %s790_s5 }
  0x44   :  { %p795_p11 = scmp.lt.s32.totalorder %s535_s17, %s535_s17  ;;  %p796_p12 = scmp.lt.s32.totalorder %s790_s5, %s790_s5 }
  0x46   :  { %v135_v47 = vld [vmem:[%s134_s30] sm:$0x1]  ;;  %p797_p13 = por %p796_p12, %p795_p11 }
  0x47   :  { %136 = vst [vmem:[#allocation2 + $0x3] sm:$0x1] %v135_v47  ;;  %137 = vst [vmem:[%s134_s30 - $0x3] sm:$0x8] %v1069_v43 }
  0x48   :  { %p798_p0 = pnand %p797_p13, %p791_p10 }
  0x4e   :  { %v147_v48 = vld [vmem:[%s146_s14] sm:$0x1] }
  0x4f   :  { %148 = vst [vmem:[#allocation2 + $0x4] sm:$0x1] %v147_v48  ;;  %149 = vst [vmem:[%s146_s14 - $0x4] sm:$0x10] %v1069_v43 }
  0x56   :  { %v159_v49 = vld [vmem:[%s158_s3] sm:$0x1] }
  0x57   :  { %160 = vst [vmem:[#allocation2 + $0x5] sm:$0x1] %v159_v49  ;;  %161 = vst [vmem:[%s158_s3 - $0x5] sm:$0x20] %v1069_v43 }
  0x5e   :  { %v171_v50 = vld [vmem:[%s170_s18] sm:$0x1] }
  0x5f   :  { %172 = vst [vmem:[#allocation2 + $0x6] sm:$0x1] %v171_v50  ;;  %173 = vst [vmem:[%s170_s18 - $0x6] sm:$0x40] %v1069_v43 }
  0x66   :  { %v183_v51 = vld [vmem:[%s182_s16] sm:$0x1] }
  0x67   :  { %184 = vst [vmem:[#allocation2 + $0x7] sm:$0x1] %v183_v51  ;;  %185 = vst [vmem:[%s182_s16 - $0x7] sm:$0x80] %v1069_v43 }
  0x6e   :  { %v186_v52 = vld [vmem:[#allocation2] sm:$0xff] }
  0x6f   :  { %v187_v53 = vsub.f32 %v1069_v43, %v186_v52 }
  0x71   :  { %690 = vmatmul.mubr.f32.vlgmr.msra.gmra.mrb[0].mxu1 %v187_v53  ;;  %v519_v54 = vrot.slane %v187_v53, 4 }
  0x72   :  { %705 = vmatprep.mubr.msk.f32.mxu1 %vm839_vm0, %v840_v6  ;;  %v757_v6 = vpack.c.bf16 %v437_v4, %v436_v2 }
  0x73   :  { %v520_v55 = vadd.f32 %v519_v54, %v187_v53 }
  0x74   :  { %758 = vmatpush3.bf16.msra.mxu1 %v757_v6 }
  0x75   :  { %v521_v56 = vrot.slane %v520_v55, 2  ;;  %759 = vmatprep.subr.bf16.mxu1 %v838_v3 }
  0x77   :  { %v522_v57 = vadd.f32 %v521_v56, %v520_v55 }
  0x78   :  { %761 = vmatpush3.bf16.msra.mxu1 %v760_v8 }
  0x79   :  { %v523_v58 = vrot.slane %v522_v57, 1 }
  0x7b   :  { %v524_v59 = vadd.f32 %v523_v58, %v522_v57 }
  0x7d   :  { %v525_v60 = vadd.f32 %v524_v59, %v1043_v42 }
  0x7f   :  { %526 = vst [vmem:[#allocation7] sm:$0x1] %v525_v60 }
  0xf6   :  { %v272_v61 = vpop.f32.mrb[0].mxu0 }
  0xf7   :  { %v656_v62 = vpop.f32.mrb[1].mxu0  ;;  %v273_v12 = vadd.f32 %v272_v61, %v205_v11 }
  0xf9   :  { %v424_v14 = vrot.slane %v273_v12, %v423_v13 }
 0x144   :  { %v342_v0 = vpop.f32.mrb[0].mxu1 }
 0x145   :  { %v691_v1 = vpop.f32.mrb[1].mxu1  ;;  %693 = vmatpush3.msra.mxu0 %v342_v0 }
 0x146   :  { %695 = vmatmul.mubr.msk.f32.vlgmr.msra.gmra.mrb[2].mxu0 %vm347_vm1, %v346_v63 }
 0x219   :  { %v417_v15 = vpop.f32.mrb[2].mxu0 }
 0x21a   :  { %v425_v16 = vadd.f32 %v424_v14, %v417_v15  ;;  %v696_v17 = vpop.f32.mrb[3].mxu0 }
 0x21c   :  { %v426_v18 = vmax.f32 %v425_v16, 0.0 }
 0x21e   :  { %v428_v19 = vsel %vm427_vm2, %v426_v18, 0.0 }
 0x21f   :  { %v429_v20 = vrot.slane %v428_v19, 4 }
 0x221   :  { %v430_v21 = vadd.f32 %v429_v20, %v428_v19 }
 0x223   :  { %v431_v22 = vrot.slane %v430_v21, 2 }
 0x225   :  { %v432_v3 = vadd.f32 %v431_v22, %v430_v21 }
 0x227   :  { %v433_v23 = vrot.slane %v432_v3, 1 }
 0x229   :  { %v434_v24 = vadd.f32 %v433_v23, %v432_v3 }
 0x22b   :  { %v435_v25 = vmul.f32 0.125, %v434_v24 }
 0x22d   :  { %706 = vmatmul.mubr.msk.f32.vlgmr.msra.gmra.mrb[2].mxu1 %vm427_vm2, %v435_v25 }
 0x22e   :  { %801 = shalt.err (!%p798_p0)
}
 0x22f   :  { %s802_s13 = scalar_lea.hbm %s1164_s10, 1920 }
 0x230   :  { %p803_p1 = scmp.ne.s32.totalorder %s1164_s10, %s802_s13  ;;  %p806_p2 = scmp.lt.u32.totalorder %s802_s13, %s1164_s10 }
 0x232   :  { %p808_p3 = pnand %p806_p2, %p803_p1 }
 0x234   :  { %811 = shalt.err (!%p808_p3)
}
 0x235   :  { %s842_s4 = smov 128   ;;  %s843_s26 = smov 8  }
 0x236   :  { %540 = dma.vmem_to_hbm [thread:$0]  %s535_s17, 1920, %s1164_s10, [#allocation6], %s842_s4, %s842_s4, %s843_s26  }
 0x237   :  { %s844_s16 = smov [#allocation7]  }
 0x238   :  { %s547_s2 = sshll.u32 %s844_s16, 4  ;;  %s548_s2 = int_to_ptr.vmem [resolvable:$true] %s547_s2 }
 0x239   :  { %s812_s21 = scalar_lea.vmem %s548_s2, 16  ;;  %s816_s22 = scalar_lea.vmem %s548_s2, 32 }
 0x23a   :  { %p813_p4 = scmp.ne.s32.totalorder %s548_s2, %s812_s21  ;;  %p817_p5 = scmp.lt.s32.totalorder %s548_s2, %s548_s2 }
 0x23b   :  { %p818_p6 = scmp.lt.s32.totalorder %s816_s22, %s812_s21 }
 0x23d   :  { %p819_p7 = por %p818_p6, %p817_p5 }
 0x23f   :  { %p820_p8 = pnand %p819_p7, %p813_p4 }
 0x241   :  { %823 = shalt.err (!%p820_p8)
}
 0x242   :  { %s824_s25 = scalar_lea.hbm %s1165_s11, 16 }
 0x243   :  { %p825_p9 = scmp.ne.s32.totalorder %s1165_s11, %s824_s25  ;;  %p828_p10 = scmp.lt.u32.totalorder %s824_s25, %s1165_s11 }
 0x245   :  { %p830_p11 = pnand %p828_p10, %p825_p9 }
 0x247   :  { %833 = shalt.err (!%p830_p11)
}
 0x248   :  { %550 = dma.vmem_to_hbm [thread:$0]  %s548_s2, 16, %s1165_s11, [#allocation8]   ;;  %v440_v26 = vld [vmem:[%s1161_s7] sm:$0x1] }
 0x300   :  { %v510_v27 = vpop.f32.mrb[2].mxu1 }
 0x301   :  { %v511_v28 = vadd.f32 %v510_v27, %v440_v26  ;;  %v707_v29 = vpop.f32.mrb[3].mxu1 }
 0x303   :  { %v517_v30 = vrot.slane %v511_v28, %v423_v13 }
 0x305   :  { %518 = vst [vmem:[%s1163_s9] sm:$0xff] %v517_v30 }
 0x306   :  { %834 = dma.done.wait [#allocation6], 1920  }
 0x307   :  { %835 = vsyncadd [#allocation6], 4294965376 }
 0x308   :  { %836 = dma.done.wait [#allocation8], 16  }
 0x309   :  { %837 = vsyncadd [#allocation8], 4294967280 }
 0x30a   :  { %559 = vsyncpa [#allocation6], 1 }
 0x30b   :  { %560 = vsyncpa [#allocation8], 1 }

</bundles_post_ra>
